<compile_context>
chip_gen: v7x
topology: tpu7x:2x2x1
jax: 0.10.0
libtpu: 0.0.40
codegen_flags: <defaults>
</compile_context>

<pallas_src>
import math
import functools

import jax
import jax.numpy as jnp
from jax.experimental import pallas as pl
from jax.experimental.pallas import tpu as pltpu


def _round_up(x, m):
    return (x + m - 1) // m * m


def _pick_head_group(heads, dim_head, lane_target=256):
    """Largest head group G (dividing `heads`) whose fused width G*Dh is a
    128-lane multiple and <= lane_target; fall back to all heads (block ==
    full extent of the channel axis, which is always a legal BlockSpec)."""
    best = None
    for g in range(1, heads + 1):
        if heads % g == 0 and g * dim_head <= lane_target and (g * dim_head) % 128 == 0:
            best = g
    return best if best is not None else heads


# ---------------------------------------------------------------------------
# Projection kernels (row-tiled GEMMs, weights resident across the grid)
# ---------------------------------------------------------------------------

def _multi_linear_kernel(x_ref, *refs, n_out):
    # refs = (w_0..w_{n-1}, o_0..o_{n-1}); x tile loaded once, reused for all
    # weights; f32 accumulation via preferred_element_type.
    x = x_ref[...]
    for w_ref, o_ref in zip(refs[:n_out], refs[n_out:]):
        o_ref[...] = jnp.dot(
            x, w_ref[...], preferred_element_type=jnp.float32).astype(o_ref.dtype)


def _linear_bias_kernel(x_ref, w_ref, b_ref, o_ref):
    acc = jnp.dot(x_ref[...], w_ref[...], preferred_element_type=jnp.float32)
    acc = acc + b_ref[...].astype(jnp.float32)
    o_ref[...] = acc.astype(o_ref.dtype)


# tm capped at 256 (not 512): with f32 operands and a wide resident weight,
# 512-row tiles can blow past v7x's 64 MiB VMEM; 256 keeps 2x input + 2x
# output buffers + weights comfortably inside the explicit 64 MiB limit.
_VMEM_LIMIT = 64 * 1024 * 1024


def pallas_multi_linear(x2d, weights, *, tm_max=256):
    """ys[i] = x2d @ weights[i].  x2d: (M, K); weights[i]: (K, Ni)."""
    M, K = x2d.shape
    n_out = len(weights)
    ns = [w.shape[1] for w in weights]
    itemsize = jnp.dtype(x2d.dtype).itemsize

    tm = min(tm_max, _round_up(M, 8))
    Mp = _round_up(M, tm)
    xp = x2d if Mp == M else jnp.pad(x2d, ((0, Mp - M), (0, 0)))
    grid = (Mp // tm,)

    in_specs = [pl.BlockSpec((tm, K), lambda i: (i, 0))]
    in_specs += [pl.BlockSpec((K, n), lambda i: (0, 0)) for n in ns]   # resident
    out_specs = tuple(pl.BlockSpec((tm, n), lambda i: (i, 0)) for n in ns)
    out_shape = tuple(jax.ShapeDtypeStruct((Mp, n), x2d.dtype) for n in ns)

    cost = pl.CostEstimate(
        flops=2 * Mp * K * sum(ns),
        transcendentals=0,
        bytes_accessed=(Mp * K + K * sum(ns) + Mp * sum(ns)) * itemsize,
    )

    outs = pl.pallas_call(
        functools.partial(_multi_linear_kernel, n_out=n_out),
        out_shape=out_shape,
        grid_spec=pltpu.PrefetchScalarGridSpec(
            num_scalar_prefetch=0,
            grid=grid,
            in_specs=in_specs,
            out_specs=out_specs,
        ),
        compiler_params=pltpu.CompilerParams(
            dimension_semantics=("parallel",),
            vmem_limit_bytes=_VMEM_LIMIT),
        cost_estimate=cost,
    )(xp, *weights)

    if not isinstance(outs, (list, tuple)):
        outs = (outs,)
    if Mp != M:
        outs = tuple(o[:M] for o in outs)
    return tuple(outs)


def pallas_linear(x2d, w, b=None, *, tm_max=256):
    """y = x2d @ w (+ b)."""
    if b is None:
        return pallas_multi_linear(x2d, (w,), tm_max=tm_max)[0]

    M, K = x2d.shape
    N = w.shape[1]
    itemsize = jnp.dtype(x2d.dtype).itemsize

    tm = min(tm_max, _round_up(M, 8))
    Mp = _round_up(M, tm)
    xp = x2d if Mp == M else jnp.pad(x2d, ((0, Mp - M), (0, 0)))
    grid = (Mp // tm,)

    cost = pl.CostEstimate(
        flops=2 * Mp * K * N,
        transcendentals=0,
        bytes_accessed=(Mp * K + K * N + N + Mp * N) * itemsize,
    )

    out = pl.pallas_call(
        _linear_bias_kernel,
        out_shape=jax.ShapeDtypeStruct((Mp, N), x2d.dtype),
        grid_spec=pltpu.PrefetchScalarGridSpec(
            num_scalar_prefetch=0,
            grid=grid,
            in_specs=[
                pl.BlockSpec((tm, K), lambda i: (i, 0)),
                pl.BlockSpec((K, N), lambda i: (0, 0)),     # resident weight
                pl.BlockSpec((1, N), lambda i: (0, 0)),      # resident bias
            ],
            out_specs=pl.BlockSpec((tm, N), lambda i: (i, 0)),
        ),
        compiler_params=pltpu.CompilerParams(
            dimension_semantics=("parallel",),
            vmem_limit_bytes=_VMEM_LIMIT),
        cost_estimate=cost,
    )(xp, w, b.reshape(1, N))
    return out[:M] if Mp != M else out


# ---------------------------------------------------------------------------
# Flash attention kernel (online softmax, heads folded into the grid)
# ---------------------------------------------------------------------------

def _flash_attn_kernel(q_ref, k_ref, v_ref, o_ref, m_sc, l_sc, acc_sc,
                       *, dh, g, nk, tk):
    # q_ref/o_ref: (tq, g*dh); k_ref/v_ref: (tk, g*dh); q is pre-scaled by
    # 1/sqrt(dh) (folded into Wq).  Scratch: m/l (tq, g), acc (tq, g*dh), f32.
    ki = pl.program_id(3)

    @pl.when(ki == 0)
    def _():
        m_sc[...] = jnp.full(m_sc.shape, -jnp.inf, jnp.float32)
        l_sc[...] = jnp.zeros(l_sc.shape, jnp.float32)
        acc_sc[...] = jnp.zeros(acc_sc.shape, jnp.float32)

    q = q_ref[...]
    k = k_ref[...]
    v = v_ref[...]
    m_prev = m_sc[...]
    l_prev = l_sc[...]
    acc_prev = acc_sc[...]

    # Mask padded keys (only generated when nk is not a tile multiple).
    if nk % tk != 0:
        key_idx = ki * tk + jax.lax.broadcasted_iota(jnp.int32, (1, tk), 1)
        kv_valid = key_idx < nk
    else:
        kv_valid = None

    m_cols, l_cols, acc_cols = [], [], []
    for h in range(g):                                  # static unrolled loop
        sl = slice(h * dh, (h + 1) * dh)
        s = jax.lax.dot_general(q[:, sl], k[:, sl], (((1,), (1,)), ((), ())),
                                preferred_element_type=jnp.float32)
        if kv_valid is not None:
            s = jnp.where(kv_valid, s, -jnp.inf)

        mp = m_prev[:, h:h + 1]
        mn = jnp.maximum(mp, s.max(axis=-1, keepdims=True))
        alpha = jnp.exp(mp - mn)
        p = jnp.exp(s - mn)
        l_cols.append(alpha * l_prev[:, h:h + 1] + p.sum(axis=-1, keepdims=True))
        acc_cols.append(alpha * acc_prev[:, sl] +
                        jnp.dot(p.astype(v.dtype), v[:, sl],
                                preferred_element_type=jnp.float32))
        m_cols.append(mn)

    def cat(xs):
        return xs[0] if len(xs) == 1 else jnp.concatenate(xs, axis=-1)

    m_sc[...] = cat(m_cols)
    l_sc[...] = cat(l_cols)
    acc_sc[...] = cat(acc_cols)

    @pl.when(ki == pl.num_programs(3) - 1)
    def _():
        l = l_sc[...]
        acc = acc_sc[...]
        outs = [acc[:, h * dh:(h + 1) * dh] *
                pl.reciprocal(l[:, h:h + 1], approx=True) for h in range(g)]
        o_ref[...] = cat(outs).astype(o_ref.dtype)      # one lane-dense store


def pallas_attention(q, k, v, *, heads, dim_head, tq_max=256, tk_max=256):
    """q: (B, Nq, H*Dh), k/v: (B, Nk, H*Dh) -> (B, Nq, H*Dh).
    Heads stay folded in the channel axis; q must already carry the
    1/sqrt(Dh) softmax scale."""
    B, Nq, inner = q.shape
    _, Nk, _ = k.shape
    assert inner == heads * dim_head
    itemsize = jnp.dtype(q.dtype).itemsize

    g = _pick_head_group(heads, dim_head)
    gdh = g * dim_head

    # Bounded tiles + padding (padded keys are masked inside the kernel;
    # padded query rows are sliced off afterwards).
    tq = min(tq_max, _round_up(Nq, 8))
    tk = min(tk_max, _round_up(Nk, 8))
    nq_pad = _round_up(Nq, tq)
    nk_pad = _round_up(Nk, tk)
    if nq_pad != Nq:
        q = jnp.pad(q, ((0, 0), (0, nq_pad - Nq), (0, 0)))
    if nk_pad != Nk:
        k = jnp.pad(k, ((0, 0), (0, nk_pad - Nk), (0, 0)))
        v = jnp.pad(v, ((0, 0), (0, nk_pad - Nk), (0, 0)))

    grid = (B, heads // g, nq_pad // tq, nk_pad // tk)

    cost = pl.CostEstimate(
        flops=4 * B * heads * nq_pad * nk_pad * dim_head,
        transcendentals=B * heads * nq_pad * nk_pad,
        bytes_accessed=(q.size + k.size + v.size + B * nq_pad * inner) * itemsize,
    )

    kernel = functools.partial(_flash_attn_kernel, dh=dim_head, g=g, nk=Nk, tk=tk)
    out = pl.pallas_call(
        kernel,
        out_shape=jax.ShapeDtypeStruct((B, nq_pad, inner), q.dtype),
        grid_spec=pltpu.PrefetchScalarGridSpec(
            num_scalar_prefetch=0,
            grid=grid,
            in_specs=[
                pl.BlockSpec((None, tq, gdh), lambda b, hg, qi, ki: (b, qi, hg)),
                pl.BlockSpec((None, tk, gdh), lambda b, hg, qi, ki: (b, ki, hg)),
                pl.BlockSpec((None, tk, gdh), lambda b, hg, qi, ki: (b, ki, hg)),
            ],
            out_specs=pl.BlockSpec((None, tq, gdh),
                                   lambda b, hg, qi, ki: (b, qi, hg)),
            scratch_shapes=[
                pltpu.VMEM((tq, g), jnp.float32),     # running max (per head)
                pltpu.VMEM((tq, g), jnp.float32),     # running denom (per head)
                pltpu.VMEM((tq, gdh), jnp.float32),   # output accumulator
            ],
        ),
        compiler_params=pltpu.CompilerParams(
            dimension_semantics=("parallel", "parallel", "parallel", "arbitrary")),
        cost_estimate=cost,
    )(q, k, v)
    return out[:, :Nq] if nq_pad != Nq else out


# ---------------------------------------------------------------------------
# Module forward
# ---------------------------------------------------------------------------

def memory_efficient_cross_attention(x, context, wq, wk, wv, wo, bo, *, heads):
    """Pallas forward of MemoryEfficientCrossAttention (mask=None, dropout=0)."""
    B, Nq, Cq = x.shape
    inner_dim = wq.shape[1]
    dim_head = inner_dim // heads
    scale = 1.0 / math.sqrt(dim_head)

    self_attn = context is None
    ctx = x if self_attn else context
    _, Nk, Ck = ctx.shape

    # Fold the softmax scale into Wq once (free; removes a tq*tk VPU multiply
    # from every kv step of the attention kernel).
    wq_s = (wq.astype(jnp.float32) * scale).astype(wq.dtype)

    x2d = x.reshape(B * Nq, Cq)
    if self_attn:
        # One GEMM over x with three resident weights and three separate
        # lane-dense outputs (no post-hoc slicing of a fused buffer).
        q2d, k2d, v2d = pallas_multi_linear(x2d, (wq_s, wk, wv))
    else:
        ctx2d = ctx.reshape(B * Nk, Ck)
        (q2d,) = pallas_multi_linear(x2d, (wq_s,))
        k2d, v2d = pallas_multi_linear(ctx2d, (wk, wv))

    # Heads stay folded in the channel axis: (B, N, H*Dh). No transposes.
    q = q2d.reshape(B, Nq, inner_dim)
    k = k2d.reshape(B, Nk, inner_dim)
    v = v2d.reshape(B, Nk, inner_dim)

    o = pallas_attention(q, k, v, heads=heads, dim_head=dim_head)

    # to_out = Linear(inner_dim, query_dim) + Dropout(p=0.0) (identity).
    out2d = pallas_linear(o.reshape(B * Nq, inner_dim), wo, bo)
    # TODO(synk): `mask` raises NotImplementedError in the torch module and is
    # not supported here either.
    return out2d.reshape(B, Nq, wo.shape[1])


# ---------------------------------------------------------------------------
# Pure-JAX reference
# ---------------------------------------------------------------------------

def mecha_ref(x, context, wq, wk, wv, wo, bo, *, heads):
    if context is None:
        context = x
    hp = jax.lax.Precision.HIGHEST
    q = jnp.einsum("bnc,ci->bni", x, wq, precision=hp)
    k = jnp.einsum("bnc,ci->bni", context, wk, precision=hp)
    v = jnp.einsum("bnc,ci->bni", context, wv, precision=hp)
    B, Nq, inner = q.shape
    D = inner // heads

    def split(t):
        return t.reshape(B, -1, heads, D).transpose(0, 2, 1, 3)

    qh, kh, vh = split(q), split(k), split(v)
    s = jnp.einsum("bhqd,bhkd->bhqk", qh, kh, precision=hp) / math.sqrt(D)
    p = jax.nn.softmax(s, axis=-1)
    o = jnp.einsum("bhqk,bhkd->bhqd", p, vh, precision=hp)
    o = o.transpose(0, 2, 1, 3).reshape(B, Nq, inner)
    return jnp.einsum("bni,io->bno", o, wo, precision=hp) + bo


if __name__ == "__main__":
    # Small but representative config: query_dim=32, heads=4, dim_head=16
    # -> inner_dim=64; B=2, seq=16.
    B, N = 2, 16
    query_dim = 32
    heads = 4
    dim_head = 16
    inner_dim = heads * dim_head

    key = jax.random.PRNGKey(0)
    kx, kc, kq, kk, kv_, ko, kb = jax.random.split(key, 7)

    x = jax.random.normal(kx, (B, N, query_dim), dtype=jnp.float32)

    bq = 1.0 / math.sqrt(query_dim)
    wq = jax.random.uniform(kq, (query_dim, inner_dim), jnp.float32, -bq, bq)
    wk = jax.random.uniform(kk, (query_dim, inner_dim), jnp.float32, -bq, bq)
    wv = jax.random.uniform(kv_, (query_dim, inner_dim), jnp.float32, -bq, bq)
    bo_bound = 1.0 / math.sqrt(inner_dim)
    wo = jax.random.uniform(ko, (inner_dim, query_dim), jnp.float32,
                            -bo_bound, bo_bound)
    bo = jax.random.uniform(kb, (query_dim,), jnp.float32, -bo_bound, bo_bound)

    # Self-attention (context=None).
    out = memory_efficient_cross_attention(x, None, wq, wk, wv, wo, bo,
                                           heads=heads)
    out = jax.block_until_ready(out)
    ref = mecha_ref(x, None, wq, wk, wv, wo, bo, heads=heads)
    assert out.shape == (B, N, query_dim)
    err = float(jnp.max(jnp.abs(out - ref)))
    assert jnp.allclose(out, ref, atol=2e-3, rtol=2e-3), \
        f"self-attn mismatch vs reference (max abs err {err})"

    # Cross-attention with an awkward context length (exercises kv padding +
    # the in-kernel -inf key mask).
    Nk = 7
    ctx = jax.random.normal(kc, (B, Nk, query_dim), dtype=jnp.float32)
    out_x = memory_efficient_cross_attention(x, ctx, wq, wk, wv, wo, bo,
                                             heads=heads)
    out_x = jax.block_until_ready(out_x)
    ref_x = mecha_ref(x, ctx, wq, wk, wv, wo, bo, heads=heads)
    err_x = float(jnp.max(jnp.abs(out_x - ref_x)))
    assert jnp.allclose(out_x, ref_x, atol=2e-3, rtol=2e-3), \
        f"cross-attn mismatch vs reference (max abs err {err_x})"

    print("KERNEL_OK")
</pallas_src>

<mosaic_0001>
module attributes {stable_mosaic.version = 11 : i64} {
  func.func @_multi_linear_kernel(%arg0: i32, %arg1: memref<32x32xf32, #tpu.memory_space<vmem>>, %arg2: memref<32x64xf32, #tpu.memory_space<vmem>>, %arg3: memref<32x64xf32, #tpu.memory_space<vmem>>, %arg4: memref<32x64xf32, #tpu.memory_space<vmem>>, %arg5: memref<32x64xf32, #tpu.memory_space<vmem>>, %arg6: memref<32x64xf32, #tpu.memory_space<vmem>>, %arg7: memref<32x64xf32, #tpu.memory_space<vmem>>) attributes {dimension_semantics = [#tpu.dimension_semantics<parallel>], iteration_bounds = array<i64: 1>, scalar_prefetch = 0 : i64, scratch_operands = 0 : i64, tpu.core_type = #tpu.core_type<tc>, window_params = [{transform_indices = @transform_0, window_bounds = array<i64: 32, 32>}, {pipeline_mode = #tpu.pipeline_mode<synchronous>, transform_indices = @transform_1, window_bounds = array<i64: 32, 64>}, {pipeline_mode = #tpu.pipeline_mode<synchronous>, transform_indices = @transform_2, window_bounds = array<i64: 32, 64>}, {pipeline_mode = #tpu.pipeline_mode<synchronous>, transform_indices = @transform_3, window_bounds = array<i64: 32, 64>}, {transform_indices = @transform_4, window_bounds = array<i64: 32, 64>}, {transform_indices = @transform_5, window_bounds = array<i64: 32, 64>}, {transform_indices = @transform_6, window_bounds = array<i64: 32, 64>}]} {
    %c0 = arith.constant 0 : index
    %c0_0 = arith.constant 0 : index
    %0 = vector.load %arg1[%c0, %c0_0] : memref<32x32xf32, #tpu.memory_space<vmem>>, vector<32x32xf32>
    %c0_1 = arith.constant 0 : index
    %c0_2 = arith.constant 0 : index
    %1 = vector.load %arg2[%c0_1, %c0_2] : memref<32x64xf32, #tpu.memory_space<vmem>>, vector<32x64xf32>
    %cst = arith.constant dense<0.000000e+00> : vector<32x64xf32>
    %2 = tpu.matmul %0, %1, %cst {dimension_numbers = #tpu.dot_dimension_numbers<[1], [0], [0], [1], [0, 0, 1, 1], [], []>} : vector<32x32xf32>, vector<32x64xf32>, vector<32x64xf32> -> vector<32x64xf32>
    %c0_3 = arith.constant 0 : index
    %c0_4 = arith.constant 0 : index
    %3 = vector.load %arg5[%c0_3, %c0_4] : memref<32x64xf32, #tpu.memory_space<vmem>>, vector<32x64xf32>
    tpu.vector_store %arg5[%c0_3, %c0_4], %2 {strides = array<i32>} : memref<32x64xf32, #tpu.memory_space<vmem>>, vector<32x64xf32>,
    %c0_5 = arith.constant 0 : index
    %c0_6 = arith.constant 0 : index
    %4 = vector.load %arg3[%c0_5, %c0_6] : memref<32x64xf32, #tpu.memory_space<vmem>>, vector<32x64xf32>
    %cst_7 = arith.constant dense<0.000000e+00> : vector<32x64xf32>
    %5 = tpu.matmul %0, %4, %cst_7 {dimension_numbers = #tpu.dot_dimension_numbers<[1], [0], [0], [1], [0, 0, 1, 1], [], []>} : vector<32x32xf32>, vector<32x64xf32>, vector<32x64xf32> -> vector<32x64xf32>
    %c0_8 = arith.constant 0 : index
    %c0_9 = arith.constant 0 : index
    %6 = vector.load %arg6[%c0_8, %c0_9] : memref<32x64xf32, #tpu.memory_space<vmem>>, vector<32x64xf32>
    tpu.vector_store %arg6[%c0_8, %c0_9], %5 {strides = array<i32>} : memref<32x64xf32, #tpu.memory_space<vmem>>, vector<32x64xf32>,
    %c0_10 = arith.constant 0 : index
    %c0_11 = arith.constant 0 : index
    %7 = vector.load %arg4[%c0_10, %c0_11] : memref<32x64xf32, #tpu.memory_space<vmem>>, vector<32x64xf32>
    %cst_12 = arith.constant dense<0.000000e+00> : vector<32x64xf32>
    %8 = tpu.matmul %0, %7, %cst_12 {dimension_numbers = #tpu.dot_dimension_numbers<[1], [0], [0], [1], [0, 0, 1, 1], [], []>} : vector<32x32xf32>, vector<32x64xf32>, vector<32x64xf32> -> vector<32x64xf32>
    %c0_13 = arith.constant 0 : index
    %c0_14 = arith.constant 0 : index
    %9 = vector.load %arg7[%c0_13, %c0_14] : memref<32x64xf32, #tpu.memory_space<vmem>>, vector<32x64xf32>
    tpu.vector_store %arg7[%c0_13, %c0_14], %8 {strides = array<i32>} : memref<32x64xf32, #tpu.memory_space<vmem>>, vector<32x64xf32>,
    return
  }
  func.func @transform_0(%arg0: i32) -> (i32, i32) {
    %c0_i32 = arith.constant 0 : i32
    %c0_i32_0 = arith.constant 0 : i32
    return %arg0, %c0_i32 : i32, i32
  }
  func.func @transform_1(%arg0: i32) -> (i32, i32) {
    %c0_i32 = arith.constant 0 : i32
    %c0_i32_0 = arith.constant 0 : i32
    %c0_i32_1 = arith.constant 0 : i32
    return %c0_i32, %c0_i32_0 : i32, i32
  }
  func.func @transform_2(%arg0: i32) -> (i32, i32) {
    %c0_i32 = arith.constant 0 : i32
    %c0_i32_0 = arith.constant 0 : i32
    %c0_i32_1 = arith.constant 0 : i32
    return %c0_i32, %c0_i32_0 : i32, i32
  }
  func.func @transform_3(%arg0: i32) -> (i32, i32) {
    %c0_i32 = arith.constant 0 : i32
    %c0_i32_0 = arith.constant 0 : i32
    %c0_i32_1 = arith.constant 0 : i32
    return %c0_i32, %c0_i32_0 : i32, i32
  }
  func.func @transform_4(%arg0: i32) -> (i32, i32) {
    %c0_i32 = arith.constant 0 : i32
    %c0_i32_0 = arith.constant 0 : i32
    return %arg0, %c0_i32 : i32, i32
  }
  func.func @transform_5(%arg0: i32) -> (i32, i32) {
    %c0_i32 = arith.constant 0 : i32
    %c0_i32_0 = arith.constant 0 : i32
    return %arg0, %c0_i32 : i32, i32
  }
  func.func @transform_6(%arg0: i32) -> (i32, i32) {
    %c0_i32 = arith.constant 0 : i32
    %c0_i32_0 = arith.constant 0 : i32
    return %arg0, %c0_i32 : i32, i32
  }
}

</mosaic_0001>

<bundles_post_ra>
// kernel: tpu_custom_call.1
= control target key start
LH: loop header
LB: loop body
LE: loop exit
PB: predicated region body
PF: predicated region fallthrough
CT: control target
= control target key end

     0   :  { %12 = vsyncpa [#allocation3], 0  ;;  %s900_s0 = inlined_call_operand.hbm [shape: f32[32,32], index: 0, kind: input, shape index: {}]   ;;  %s901_s1 = inlined_call_operand.hbm [shape: f32[32,64], index: 1, kind: input, shape index: {}]   ;;  %s902_s2 = inlined_call_operand.hbm [shape: f32[32,64], index: 2, kind: input, shape index: {}]   ;;  %s903_s3 = inlined_call_operand.hbm [shape: f32[32,64], index: 3, kind: input, shape index: {}]   ;;  %s904_s4 = inlined_call_operand.hbm [shape: f32[32,64], index: 4, kind: output, shape index: {0}]   ;;  %s905_s5 = inlined_call_operand.hbm [shape: f32[32,64], index: 5, kind: output, shape index: {1}]   ;;  %s906_s6 = inlined_call_operand.hbm [shape: f32[32,64], index: 6, kind: output, shape index: {2}]  }
   0x1   :  { %13 = vsyncpa [#allocation6], 0 }
   0x2   :  { %14 = vsyncpa [#allocation9], 0 }
   0x3   :  { %15 = vsyncpa [#allocation4], 0 }
   0x4   :  { %16 = vsyncpa [#allocation12], 0  ;;  %s703_s21 = smov [#allocation5]   ;;  %s704_s23 = smov [#allocation2]  }
   0x5   :  { %s34_s22 = sshll.u32 %s703_s21, 4  ;;  %s22_s24 = sshll.u32 %s704_s23, 4  ;;  %s35_s22 = int_to_ptr.vmem [resolvable:$true] %s34_s22  ;;  %s747_s24 = int_to_ptr.vmem [resolvable:$true] %s22_s24 }
   0x6   :  { %s539_s27 = scalar_lea.hbm %s901_s1, 512 }
   0x7   :  { %p540_p0 = scmp.ne.s32.totalorder %s901_s1, %s539_s27  ;;  %p543_p1 = scmp.lt.u32.totalorder %s539_s27, %s901_s1 }
   0x9   :  { %p545_p2 = pnand %p543_p1, %p540_p0 }
   0xb   :  { %548 = shalt.err (!%p545_p2)
}
   0xc   :  { %s549_s8 = scalar_lea.vmem %s35_s22, 512  ;;  %p554_p4 = scmp.lt.s32.totalorder %s35_s22, %s35_s22 }
   0xd   :  { %p550_p3 = scmp.ne.s32.totalorder %s35_s22, %s549_s8  ;;  %p555_p5 = scmp.lt.s32.totalorder %s549_s8, %s549_s8 }
   0xf   :  { %p556_p6 = por %p555_p5, %p554_p4 }
  0x11   :  { %p557_p7 = pnand %p556_p6, %p550_p3 }
  0x13   :  { %560 = shalt.err (!%p557_p7)
}
  0x14   :  { %s705_s9 = smov 128   ;;  %s706_s10 = smov 8  }
  0x15   :  { %40 = dma.hbm_to_vmem [thread:$0]  %s901_s1, 512, %s35_s22, [#allocation6], %s705_s9, %s705_s9, %s706_s10  }
  0x16   :  { %s561_s15 = scalar_lea.hbm %s900_s0, 512 }
  0x17   :  { %p562_p8 = scmp.ne.s32.totalorder %s900_s0, %s561_s15  ;;  %p565_p9 = scmp.lt.u32.totalorder %s561_s15, %s900_s0 }
  0x19   :  { %p567_p10 = pnand %p565_p9, %p562_p8 }
  0x1b   :  { %570 = shalt.err (!%p567_p10)
}
  0x1c   :  { %s571_s20 = scalar_lea.vmem %s747_s24, 512  ;;  %p576_p12 = scmp.lt.s32.totalorder %s747_s24, %s747_s24 }
  0x1d   :  { %p572_p11 = scmp.ne.s32.totalorder %s747_s24, %s571_s20  ;;  %p577_p13 = scmp.lt.s32.totalorder %s571_s20, %s571_s20 }
  0x1f   :  { %p578_p0 = por %p577_p13, %p576_p12 }
  0x21   :  { %p579_p1 = pnand %p578_p0, %p572_p11 }
  0x23   :  { %582 = shalt.err (!%p579_p1)
}
  0x24   :  { %28 = dma.hbm_to_vmem [thread:$0]  %s900_s0, 512, %s747_s24, [#allocation3], %s705_s9, %s705_s9, %s706_s10  }
  0x25   :  { %s707_s22 = smov [#allocation7]   ;;  %s708_s25 = smov [#allocation8]  }
  0x26   :  { %s46_s23 = sshll.u32 %s707_s22, 4  ;;  %s58_s26 = sshll.u32 %s708_s25, 4  ;;  %s47_s23 = int_to_ptr.vmem [resolvable:$true] %s46_s23  ;;  %s784_s26 = int_to_ptr.vmem [resolvable:$true] %s58_s26 }
  0x27   :  { %s583_s29 = scalar_lea.hbm %s902_s2, 512 }
  0x28   :  { %p584_p2 = scmp.ne.s32.totalorder %s902_s2, %s583_s29  ;;  %p587_p3 = scmp.lt.u32.totalorder %s583_s29, %s902_s2 }
  0x2a   :  { %p589_p4 = pnand %p587_p3, %p584_p2 }
  0x2c   :  { %592 = shalt.err (!%p589_p4)
}
  0x2d   :  { %s593_s0 = scalar_lea.vmem %s47_s23, 512  ;;  %p598_p6 = scmp.lt.s32.totalorder %s47_s23, %s47_s23 }
  0x2e   :  { %p594_p5 = scmp.ne.s32.totalorder %s47_s23, %s593_s0  ;;  %p599_p7 = scmp.lt.s32.totalorder %s593_s0, %s593_s0 }
  0x30   :  { %p600_p8 = por %p599_p7, %p598_p6 }
  0x32   :  { %p601_p9 = pnand %p600_p8, %p594_p5 }
  0x34   :  { %604 = shalt.err (!%p601_p9)
}
  0x35   :  { %52 = dma.hbm_to_vmem [thread:$0]  %s902_s2, 512, %s47_s23, [#allocation6], %s705_s9, %s705_s9, %s706_s10  }
  0x36   :  { %s605_s15 = scalar_lea.hbm %s903_s3, 512 }
  0x37   :  { %p606_p10 = scmp.ne.s32.totalorder %s903_s3, %s605_s15  ;;  %p609_p11 = scmp.lt.u32.totalorder %s605_s15, %s903_s3 }
  0x39   :  { %p611_p12 = pnand %p609_p11, %p606_p10 }
  0x3b   :  { %614 = shalt.err (!%p611_p12)
}
  0x3c   :  { %s615_s20 = scalar_lea.vmem %s784_s26, 512  ;;  %p620_p0 = scmp.lt.s32.totalorder %s784_s26, %s784_s26 }
  0x3d   :  { %p616_p13 = scmp.ne.s32.totalorder %s784_s26, %s615_s20  ;;  %p621_p1 = scmp.lt.s32.totalorder %s615_s20, %s615_s20 }
  0x3f   :  { %p622_p2 = por %p621_p1, %p620_p0 }
  0x41   :  { %p623_p3 = pnand %p622_p2, %p616_p13 }
  0x43   :  { %626 = shalt.err (!%p623_p3)
}
  0x44   :  { %64 = dma.hbm_to_vmem [thread:$0]  %s903_s3, 512, %s784_s26, [#allocation9], %s705_s9, %s705_s9, %s706_s10  }
  0x45   :  { %693 = dma.done.wait [#allocation3], 512  }
  0x46   :  { %694 = vsyncadd [#allocation3], 4294966784 }
  0x47   :  { %695 = dma.done.wait [#allocation6], 1024  }
  0x48   :  { %696 = vsyncadd [#allocation6], 4294966272 }
  0x49   :  { %697 = dma.done.wait [#allocation9], 512  }
  0x4a   :  { %698 = vsyncadd [#allocation9], 4294966784  ;;  %v81_v0 = vld [vmem:[#allocation5] sm:$0xff]  ;;  %v82_v1 = vld [vmem:[#allocation5 + $0x8] sm:$0xff]  ;;  %vm85_vm0 = vcmask 261120   ;;  %vm183_vm1 = vcmask 523264  }
  0x4b   :  { %v188_v2 = vld [vmem:[#allocation7] sm:$0xff]  ;;  %v502_v3 = vpack.c.bf16 %v82_v1, %v81_v0  ;;  %v189_v4 = vld [vmem:[#allocation7 + $0x8] sm:$0xff]  ;;  %v83_v5 = vld [vmem:[#allocation5 + $0x10] sm:$0xff]  ;;  %s709_s3 = smov [#allocation10]   ;;  %s710_s22 = smov [#allocation11]  }
  0x4c   :  { %v84_v6 = vld [vmem:[#allocation5 + $0x18] sm:$0xff]  ;;  %v510_v7 = vpack.c.bf16 %v189_v4, %v188_v2  ;;  %v190_v9 = vld [vmem:[#allocation7 + $0x10] sm:$0xff]  ;;  %v77_v11 = vld [vmem:[#allocation2] sm:$0xff]  ;;  %s379_s21 = sshll.u32 %s709_s3, 4  ;;  %s391_s23 = sshll.u32 %s710_s22, 4  ;;  %s380_s21 = int_to_ptr.vmem [resolvable:$true] %s379_s21  ;;  %s838_s23 = int_to_ptr.vmem [resolvable:$true] %s391_s23 }
  0x4d   :  { %v506_v8 = vpack.c.bf16 %v84_v6, %v83_v5  ;;  %v191_v10 = vld [vmem:[#allocation7 + $0x18] sm:$0xff]  ;;  %503 = vmatprep.subr.bf16.mxu0 %v502_v3  ;;  %468 = vmatprep.mubr.msk.f32.mxu0 %vm85_vm0, %v77_v11  ;;  %v281_v13 = vld [vmem:[#allocation8] sm:$0xff]  ;;  %v282_v14 = vld [vmem:[#allocation8 + $0x8] sm:$0xff]  ;;  %s711_s25 = smov [#allocation13]   ;;  %s627_s27 = scalar_lea.vmem %s380_s21, 512 }
  0x4e   :  { %v514_v12 = vpack.c.bf16 %v191_v10, %v190_v9  ;;  %511 = vmatprep.subr.bf16.mxu1 %v510_v7  ;;  %505 = vmatpush3.bf16.msra.mxu0 %v502_v3  ;;  %v518_v15 = vpack.c.bf16 %v282_v14, %v281_v13  ;;  %v283_v16 = vld [vmem:[#allocation8 + $0x10] sm:$0xff]  ;;  %v284_v17 = vld [vmem:[#allocation8 + $0x18] sm:$0xff]  ;;  %v78_v18 = vld [vmem:[#allocation2 + $0x8] sm:$0xff]  ;;  %s842_s26 = sshll.u32 %s711_s25, 4  ;;  %p628_p4 = scmp.ne.s32.totalorder %s380_s21, %s627_s27  ;;  %s404_s26 = int_to_ptr.vmem [resolvable:$true] %s842_s26 }
  0x4f   :  { %513 = vmatpush3.bf16.msra.mxu1 %v510_v7  ;;  %507 = vmatprep.subr.bf16.mxu0 %v506_v8  ;;  %v79_v19 = vld [vmem:[#allocation2 + $0x10] sm:$0xff]  ;;  %v522_v20 = vpack.c.bf16 %v284_v17, %v283_v16  ;;  %v80_v21 = vld [vmem:[#allocation2 + $0x18] sm:$0xff]  ;;  %p632_p5 = scmp.lt.s32.totalorder %s380_s21, %s380_s21  ;;  %p633_p6 = scmp.lt.s32.totalorder %s627_s27, %s627_s27 }
  0x50   :  { %515 = vmatprep.subr.bf16.mxu1 %v514_v12  ;;  %482 = vmatprep.mubr.msk.f32.mxu1 %vm85_vm0, %v77_v11 }
  0x51   :  { %p634_p7 = por %p633_p6, %p632_p5 }
  0x52   :  { %509 = vmatpush3.bf16.msra.mxu0 %v506_v8 }
  0x53   :  { %517 = vmatpush3.bf16.msra.mxu1 %v514_v12  ;;  %519 = vmatprep.subr.bf16.mxu0 %v518_v15  ;;  %p635_p8 = pnand %p634_p7, %p628_p4 }
  0x54   :  { %526 = vmatprep.subr.bf16.mxu1 %v518_v15 }
  0x55   :  { %469 = vmatmul.mubr.msk.f32.vlgmr.msra.gmra.mrb[0].mxu0 %vm85_vm0, %v78_v18 }
  0x56   :  { %483 = vmatmul.mubr.msk.f32.vlgmr.msra.gmra.mrb[0].mxu1 %vm85_vm0, %v78_v18  ;;  %521 = vmatpush3.bf16.msra.mxu0 %v518_v15 }
  0x57   :  { %528 = vmatpush3.bf16.msra.mxu1 %v518_v15  ;;  %471 = vmatprep.mubr.msk.f32.mxu0 %vm85_vm0, %v79_v19 }
  0x58   :  { %485 = vmatprep.mubr.msk.f32.mxu1 %vm85_vm0, %v79_v19  ;;  %523 = vmatprep.subr.bf16.mxu0 %v522_v20 }
  0x59   :  { %472 = vmatmul.mubr.msk.f32.gmra.mrb[2].mxu0 %vm85_vm0, %v80_v21  ;;  %527 = vmatprep.subr.bf16.mxu1 %v522_v20 }
  0x5a   :  { %486 = vmatmul.mubr.msk.f32.gmra.mrb[2].mxu1 %vm85_vm0, %v80_v21  ;;  %525 = vmatpush3.bf16.msra.mxu0 %v522_v20 }
  0x5b   :  { %529 = vmatpush3.bf16.msra.mxu1 %v522_v20  ;;  %496 = vmatprep.mubr.msk.f32.mxu0 %vm85_vm0, %v77_v11 }
  0x5c   :  { %499 = vmatprep.mubr.msk.f32.mxu1 %vm85_vm0, %v79_v19 }
  0x5d   :  { %497 = vmatmul.mubr.msk.f32.vlgmr.msra.gmra.mrb[4].mxu0 %vm85_vm0, %v78_v18 }
  0x5e   :  { %500 = vmatmul.mubr.msk.f32.vlgmr.msra.gmra.mrb[4].mxu1 %vm85_vm0, %v80_v21 }
 0x128   :  { %v470_v22 = vpop.f32.mrb[0].mxu0 }
 0x129   :  { %185 = vst.msk [vmem:[#allocation10 + $0x8] sm:$0xff] %vm183_vm1, %v470_v22  ;;  %v484_v23 = vpop.f32.mrb[0].mxu1  ;;  %v164_v24 = vpop.f32.mrb[1].mxu0 }
 0x12a   :  { %278 = vst.msk [vmem:[#allocation11 + $0x8] sm:$0xff] %vm183_vm1, %v484_v23  ;;  %184 = vst.msk [vmem:[#allocation10] sm:$0xff] %vm183_vm1, %v164_v24  ;;  %v258_v25 = vpop.f32.mrb[1].mxu1 }
 0x12b   :  { %277 = vst.msk [vmem:[#allocation11] sm:$0xff] %vm183_vm1, %v258_v25 }
 0x12c   :  { %v473_v26 = vpop.f32.mrb[2].mxu0 }
 0x12d   :  { %187 = vst.msk [vmem:[#allocation10 + $0x18] sm:$0xff] %vm183_vm1, %v473_v26  ;;  %v487_v27 = vpop.f32.mrb[2].mxu1  ;;  %v174_v28 = vpop.f32.mrb[3].mxu0 }
 0x12e   :  { %280 = vst.msk [vmem:[#allocation11 + $0x18] sm:$0xff] %vm183_vm1, %v487_v27  ;;  %186 = vst.msk [vmem:[#allocation10 + $0x10] sm:$0xff] %vm183_vm1, %v174_v28  ;;  %v268_v29 = vpop.f32.mrb[3].mxu1 }
 0x12f   :  { %279 = vst.msk [vmem:[#allocation11 + $0x10] sm:$0xff] %vm183_vm1, %v268_v29 }
 0x130   :  { %638 = shalt.err (!%p635_p8)
}
 0x131   :  { %s639_s30 = scalar_lea.hbm %s904_s4, 512 }
 0x132   :  { %p640_p9 = scmp.ne.s32.totalorder %s904_s4, %s639_s30  ;;  %p643_p10 = scmp.lt.u32.totalorder %s639_s30, %s904_s4 }
 0x134   :  { %p645_p11 = pnand %p643_p10, %p640_p9 }
 0x136   :  { %648 = shalt.err (!%p645_p11)
}
 0x137   :  { %385 = dma.vmem_to_hbm [thread:$0]  %s380_s21, 512, %s904_s4, [#allocation4], %s705_s9, %s705_s9, %s706_s10   ;;  %v498_v30 = vpop.f32.mrb[4].mxu0 }
 0x138   :  { %s649_s13 = scalar_lea.vmem %s838_s23, 512  ;;  %p654_p13 = scmp.lt.s32.totalorder %s838_s23, %s838_s23 }
 0x139   :  { %p650_p12 = scmp.ne.s32.totalorder %s838_s23, %s649_s13  ;;  %p655_p0 = scmp.lt.s32.totalorder %s649_s13, %s649_s13 }
 0x13b   :  { %p656_p1 = por %p655_p0, %p654_p13 }
 0x13d   :  { %p657_p2 = pnand %p656_p1, %p650_p12 }
 0x13f   :  { %660 = shalt.err (!%p657_p2)
}
 0x140   :  { %s661_s16 = scalar_lea.hbm %s905_s5, 512 }
 0x141   :  { %p662_p3 = scmp.ne.s32.totalorder %s905_s5, %s661_s16  ;;  %p665_p4 = scmp.lt.u32.totalorder %s661_s16, %s905_s5 }
 0x143   :  { %p667_p5 = pnand %p665_p4, %p662_p3 }
 0x145   :  { %670 = shalt.err (!%p667_p5)
}
 0x146   :  { %397 = dma.vmem_to_hbm [thread:$0]  %s838_s23, 512, %s905_s5, [#allocation12], %s705_s9, %s705_s9, %s706_s10   ;;  %371 = vst.msk [vmem:[#allocation13 + $0x8] sm:$0xff] %vm183_vm1, %v498_v30  ;;  %v501_v31 = vpop.f32.mrb[4].mxu1  ;;  %v351_v32 = vpop.f32.mrb[5].mxu0 }
 0x147   :  { %373 = vst.msk [vmem:[#allocation13 + $0x18] sm:$0xff] %vm183_vm1, %v501_v31  ;;  %370 = vst.msk [vmem:[#allocation13] sm:$0xff] %vm183_vm1, %v351_v32  ;;  %v361_v33 = vpop.f32.mrb[5].mxu1  ;;  %s671_s1 = scalar_lea.vmem %s404_s26, 512  ;;  %p676_p7 = scmp.lt.s32.totalorder %s404_s26, %s404_s26 }
 0x148   :  { %372 = vst.msk [vmem:[#allocation13 + $0x10] sm:$0xff] %vm183_vm1, %v361_v33  ;;  %p672_p6 = scmp.ne.s32.totalorder %s404_s26, %s671_s1  ;;  %p677_p8 = scmp.lt.s32.totalorder %s671_s1, %s671_s1 }
 0x14a   :  { %p678_p9 = por %p677_p8, %p676_p7 }
 0x14c   :  { %p679_p10 = pnand %p678_p9, %p672_p6 }
 0x14e   :  { %682 = shalt.err (!%p679_p10)
}
 0x14f   :  { %s683_s21 = scalar_lea.hbm %s906_s6, 512 }
 0x150   :  { %p684_p11 = scmp.ne.s32.totalorder %s906_s6, %s683_s21  ;;  %p687_p12 = scmp.lt.u32.totalorder %s683_s21, %s906_s6 }
 0x152   :  { %p689_p13 = pnand %p687_p12, %p684_p11 }
 0x154   :  { %692 = shalt.err (!%p689_p13)
}
 0x155   :  { %409 = dma.vmem_to_hbm [thread:$0]  %s404_s26, 512, %s906_s6, [#allocation12], %s705_s9, %s705_s9, %s706_s10  }
 0x156   :  { %699 = dma.done.wait [#allocation4], 512  }
 0x157   :  { %700 = vsyncadd [#allocation4], 4294966784 }
 0x158   :  { %701 = dma.done.wait [#allocation12], 1024  }
 0x159   :  { %702 = vsyncadd [#allocation12], 4294966272 }
 0x15a   :  { %419 = vsyncpa [#allocation3], 1 }
 0x15b   :  { %420 = vsyncpa [#allocation6], 1 }
 0x15c   :  { %421 = vsyncpa [#allocation9], 1 }
 0x15d   :  { %422 = vsyncpa [#allocation4], 1 }
 0x15e   :  { %423 = vsyncpa [#allocation12], 1 }

</bundles_post_ra>
